<compile_context>
chip_gen: v5e
topology: v5e:2x2
jax: 0.10.0
libtpu: 0.0.40
codegen_flags: <defaults>
</compile_context>

<pallas_src>
import jax
import jax.numpy as jnp
from jax.experimental import pallas as pl
from jax.experimental.pallas import tpu as pltpu


# ----------------------------------------------------------------------------- kernels
def _make_packed_kernel(precision, compute_dtype):
    """Whole 2x2 pool as ONE matmul.  x_ref: (TR, 2g*W) packed rows,
    p_ref: (2g*W, g*Wo) block-diagonal 0.25 pooling matrix, o_ref: (TR, g*Wo)."""

    def kernel(x_ref, p_ref, o_ref):
        x = x_ref[...]
        if compute_dtype is not None:
            x = x.astype(compute_dtype)
        o_ref[...] = jnp.dot(
            x,
            p_ref[...],
            preferred_element_type=jnp.float32,
            precision=precision,
        ).astype(o_ref.dtype)

    return kernel


def _make_hfirst_kernel(precision, compute_dtype):
    """H-pool first (sublane-strided row-pair sum on the VPU), then W-pool on
    the MXU.  x_ref: (TR, W), p_ref: (W, Wo) with 0.25 entries, o_ref: (TR//2, Wo)."""

    def kernel(x_ref, p_ref, o_ref):
        trh = o_ref.shape[0]
        even = x_ref[pl.ds(0, trh, stride=2), :]
        odd = x_ref[pl.ds(1, trh, stride=2), :]
        if compute_dtype is not None:
            even = even.astype(compute_dtype)
            odd = odd.astype(compute_dtype)
        s = even + odd                                    # H-pool: one strided add
        o_ref[...] = jnp.dot(                             # W-pool (+ /4) on the MXU
            s,
            p_ref[...],
            preferred_element_type=jnp.float32,
            precision=precision,
        ).astype(o_ref.dtype)

    return kernel


# ----------------------------------------------------------------------------- tuning helpers
def _vmem_budget():
    """(target_in_tile_bytes, vmem_limit_bytes) per chip generation."""
    try:
        vmem = int(pltpu.get_tpu_info().vmem_capacity_bytes)
    except Exception:
        vmem = 0
    if vmem >= 100 * 1024 * 1024:        # v5e / v6e: 128 MiB physical VMEM
        return 8 * 1024 * 1024, 64 * 1024 * 1024
    # v7x (64 MiB per TC) or unknown: conservative budget, still large tiles.
    return 4 * 1024 * 1024, 32 * 1024 * 1024


def _choose_rows(total_rows, row_bytes, target_bytes, align):
    """Row tile: `align`-aligned, near the target input-tile size.  Non-divisor
    tiles are fine (grid = cdiv, Pallas masks the ragged last block)."""
    if total_rows * row_bytes <= target_bytes:
        return total_rows, 1              # full-extent block is always legal
    tr = (target_bytes // row_bytes) // align * align
    tr = max(tr, align)
    if tr >= total_rows:
        return total_rows, 1
    return tr, pl.cdiv(total_rows, tr)


def _choose_pack_factor(num_pairs, Wo):
    """Smallest divisor g of num_pairs with g*Wo >= 128 (lane-dense output),
    capped to bound the block-diagonal matmul's flop growth."""
    if Wo >= 128:
        return 1
    g_min = -(-128 // Wo)                 # ceil(128 / Wo)
    g_cap = min(num_pairs, max(4 * g_min, 64))
    for g in range(g_min, g_cap + 1):
        if num_pairs % g == 0:
            return g
    for g in range(g_cap, 0, -1):         # best divisor below the lane target
        if num_pairs % g == 0:
            return g
    return 1


# ----------------------------------------------------------------------------- wrapper
def avgpool(x, *, target_in_tile_bytes=None, vmem_limit_bytes=None):
    """Matches the PyTorch forward:
    (x[:,:,::2,::2] + x[:,:,1::2,::2] + x[:,:,::2,1::2] + x[:,:,1::2,1::2]) / 4
    """
    N, C, H, W = x.shape
    assert H % 2 == 0 and W % 2 == 0, "even spatial dims required (as in the torch module)"
    Ho, Wo = H // 2, W // 2
    num_pairs = N * C * Ho                # rows of the flat (N*C*Ho, Wo) output
    total_rows = N * C * H

    if target_in_tile_bytes is None or vmem_limit_bytes is None:
        t_def, v_def = _vmem_budget()
        target_in_tile_bytes = target_in_tile_bytes or t_def
        vmem_limit_bytes = vmem_limit_bytes or v_def

    # Dtype-aware MXU path (perf-review item 2).
    out_dtype = x.dtype
    if x.dtype == jnp.bfloat16:
        mat_dtype, precision, compute_dtype = jnp.bfloat16, None, None
    elif x.dtype == jnp.float32:
        mat_dtype, precision, compute_dtype = jnp.float32, jax.lax.Precision.HIGHEST, None
    else:
        # Other dtypes: compute in f32 inside the kernel, cast back on store.
        mat_dtype, precision, compute_dtype = jnp.float32, jax.lax.Precision.HIGHEST, jnp.float32

    compiler_params = pltpu.CompilerParams(
        dimension_semantics=("parallel",),
        vmem_limit_bytes=vmem_limit_bytes,
    )

    g = _choose_pack_factor(num_pairs, Wo)
    if Wo < 128 and g > 1:
        # ---------------- lane-packed path: whole 2x2 pool in one matmul ----
        Rin = num_pairs // g              # packed rows
        Lin = 2 * g * W                   # input lanes  (>= 512 when g*Wo >= 128)
        Lout = g * Wo                     # output lanes (>= 128 when possible)
        xf = x.reshape(Rin, Lin)          # contiguous in HBM -> free reshape

        # Block-diagonal pooling matrix with the /4 folded in:
        # lane r*W+w contributes 0.25 to output lane p*Wo+j iff r//2==p and w//2==j.
        rw = jnp.arange(Lin)
        r_idx, w_idx = rw // W, rw % W
        pj = jnp.arange(Lout)
        p_idx, j_idx = pj // Wo, pj % Wo
        pool = jnp.where(
            (r_idx[:, None] // 2 == p_idx[None, :]) & (w_idx[:, None] // 2 == j_idx[None, :]),
            0.25,
            0.0,
        ).astype(mat_dtype)

        TR, nblk = _choose_rows(Rin, Lin * xf.dtype.itemsize, target_in_tile_bytes, align=16)
        out = pl.pallas_call(
            _make_packed_kernel(precision, compute_dtype),
            out_shape=jax.ShapeDtypeStruct((Rin, Lout), out_dtype),
            grid_spec=pltpu.PrefetchScalarGridSpec(
                num_scalar_prefetch=0,
                grid=(nblk,),
                in_specs=[
                    pl.BlockSpec((TR, Lin), lambda r: (r, 0)),
                    pl.BlockSpec((Lin, Lout), lambda r: (0, 0)),   # resident constant
                ],
                out_specs=pl.BlockSpec((TR, Lout), lambda r: (r, 0)),
            ),
            compiler_params=compiler_params,
        )(xf, pool)
        return out.reshape(N, C, Ho, Wo)

    # -------------------- H-first path (Wo >= 128, or no usable pack factor) -
    xf = x.reshape(total_rows, W)         # H even => row pairs stay adjacent
    pool = jnp.where(
        jnp.arange(W)[:, None] // 2 == jnp.arange(Wo)[None, :], 0.25, 0.0
    ).astype(mat_dtype)

    # TR multiple of 32 so the output tile (TR//2) is 16-row aligned (bf16-safe).
    TR, nblk = _choose_rows(total_rows, W * xf.dtype.itemsize, target_in_tile_bytes, align=32)
    TRo = TR // 2
    out = pl.pallas_call(
        _make_hfirst_kernel(precision, compute_dtype),
        out_shape=jax.ShapeDtypeStruct((num_pairs, Wo), out_dtype),
        grid_spec=pltpu.PrefetchScalarGridSpec(
            num_scalar_prefetch=0,
            grid=(nblk,),
            in_specs=[
                pl.BlockSpec((TR, W), lambda r: (r, 0)),
                pl.BlockSpec((W, Wo), lambda r: (0, 0)),           # resident constant
            ],
            out_specs=pl.BlockSpec((TRo, Wo), lambda r: (r, 0)),
        ),
        compiler_params=compiler_params,
    )(xf, pool)
    return out.reshape(N, C, Ho, Wo)


# ----------------------------------------------------------------------------- test
def _ref(x):
    return (
        x[:, :, ::2, ::2]
        + x[:, :, 1::2, ::2]
        + x[:, :, ::2, 1::2]
        + x[:, :, 1::2, 1::2]
    ) / 4


if __name__ == "__main__":
    key = jax.random.PRNGKey(0)

    # Primary shape (module-like): exercises the lane-packed path (Wo < 128).
    x = jax.random.normal(key, (2, 4, 16, 16), dtype=jnp.float32)
    y = avgpool(x)
    jax.block_until_ready(y)
    assert y.shape == (2, 4, 8, 8)
    err = float(jnp.max(jnp.abs(y - _ref(x))))
    assert jnp.allclose(y, _ref(x), atol=1e-5, rtol=1e-5), f"packed path mismatch: {err}"

    # Wide-W shape: exercises the H-first strided-slice + W-pool path (Wo >= 128).
    x2 = jax.random.normal(jax.random.fold_in(key, 1), (1, 2, 8, 256), dtype=jnp.float32)
    y2 = avgpool(x2)
    jax.block_until_ready(y2)
    assert y2.shape == (1, 2, 4, 128)
    err2 = float(jnp.max(jnp.abs(y2 - _ref(x2))))
    assert jnp.allclose(y2, _ref(x2), atol=1e-5, rtol=1e-5), f"H-first path mismatch: {err2}"

    print("KERNEL_OK")
</pallas_src>

<mosaic_0001>
module attributes {stable_mosaic.version = 11 : i64} {
  func.func @kernel(%arg0: i32, %arg1: memref<4x512xf32, #tpu.memory_space<vmem>>, %arg2: memref<512x128xf32, #tpu.memory_space<vmem>>, %arg3: memref<4x128xf32, #tpu.memory_space<vmem>>) attributes {dimension_semantics = [#tpu.dimension_semantics<parallel>], iteration_bounds = array<i64: 1>, scalar_prefetch = 0 : i64, scratch_operands = 0 : i64, tpu.core_type = #tpu.core_type<tc>, window_params = [{transform_indices = @transform_0, window_bounds = array<i64: 4, 512>}, {pipeline_mode = #tpu.pipeline_mode<synchronous>, transform_indices = @transform_1, window_bounds = array<i64: 512, 128>}, {transform_indices = @transform_2, window_bounds = array<i64: 4, 128>}]} {
    %c0 = arith.constant 0 : index
    %c0_0 = arith.constant 0 : index
    %0 = vector.load %arg1[%c0, %c0_0] : memref<4x512xf32, #tpu.memory_space<vmem>>, vector<4x512xf32>
    %c0_1 = arith.constant 0 : index
    %c0_2 = arith.constant 0 : index
    %1 = vector.load %arg2[%c0_1, %c0_2] : memref<512x128xf32, #tpu.memory_space<vmem>>, vector<512x128xf32>
    %cst = arith.constant dense<0.000000e+00> : vector<4x128xf32>
    %2 = tpu.matmul %0, %1, %cst {dimension_numbers = #tpu.dot_dimension_numbers<[1], [0], [0], [1], [0, 0, 1, 1], [], []>, precision = #tpu.contract_precision<fp32>} : vector<4x512xf32>, vector<512x128xf32>, vector<4x128xf32> -> vector<4x128xf32>
    %c0_3 = arith.constant 0 : index
    %c0_4 = arith.constant 0 : index
    %3 = vector.load %arg3[%c0_3, %c0_4] : memref<4x128xf32, #tpu.memory_space<vmem>>, vector<4x128xf32>
    tpu.vector_store %arg3[%c0_3, %c0_4], %2 {strides = array<i32>} : memref<4x128xf32, #tpu.memory_space<vmem>>, vector<4x128xf32>,
    return
  }
  func.func @transform_0(%arg0: i32) -> (i32, i32) {
    %c0_i32 = arith.constant 0 : i32
    %c0_i32_0 = arith.constant 0 : i32
    return %arg0, %c0_i32 : i32, i32
  }
  func.func @transform_1(%arg0: i32) -> (i32, i32) {
    %c0_i32 = arith.constant 0 : i32
    %c0_i32_0 = arith.constant 0 : i32
    %c0_i32_1 = arith.constant 0 : i32
    return %c0_i32, %c0_i32_0 : i32, i32
  }
  func.func @transform_2(%arg0: i32) -> (i32, i32) {
    %c0_i32 = arith.constant 0 : i32
    %c0_i32_0 = arith.constant 0 : i32
    return %arg0, %c0_i32 : i32, i32
  }
}

</mosaic_0001>

<bundles_post_ra>
// kernel: tpu_custom_call.1
= control target key start
LH: loop header
LB: loop body
LE: loop exit
PB: predicated region body
PF: predicated region fallthrough
CT: control target
= control target key end

     0   :  { %7 = vsyncpa [#allocation3], 0  ;;  %s2632_s0 = inlined_call_operand.hbm [shape: f32[4,512], index: 0, kind: input, shape index: {}]   ;;  %s2633_s1 = inlined_call_operand.hbm [shape: f32[512,128], index: 1, kind: input, shape index: {}]   ;;  %s2634_s2 = inlined_call_operand.hbm [shape: f32[4,128], index: 2, kind: output, shape index: {}]  }
   0x1   :  { %8 = vsyncpa [#allocation6], 0 }
   0x2   :  { %9 = vsyncpa [#allocation4], 0  ;;  %s15_s11 = sshll.u32 %s2632_s0, 4  ;;  %s1587_s12 = smov [#allocation2]   ;;  %s16_s11 = int_to_ptr.hbm [resolvable:$true] %s15_s11 }
   0x3   :  { %s17_s13 = sshll.u32 %s1587_s12, 4  ;;  %s25_s16 = sshll.u32 %s2633_s1, 4  ;;  %s18_s13 = int_to_ptr.vmem [resolvable:$true] %s17_s13  ;;  %s26_s16 = int_to_ptr.hbm [resolvable:$true] %s25_s16 }
   0x4   :  { %20 = dma.hbm_to_vmem [thread:$0]  %s16_s11, 256, %s18_s13, [#allocation3]  }
   0x5   :  { %s1588_s17 = smov [#allocation5]   ;;  %s1589_s19 = smov 128  }
   0x6   :  { %s27_s18 = sshll.u32 %s1588_s17, 4  ;;  %s1590_s20 = smov 8   ;;  %s28_s18 = int_to_ptr.vmem [resolvable:$true] %s27_s18 }
   0x7   :  { %33 = dma.hbm_to_vmem [thread:$0]  %s26_s16, 8192, %s28_s18, [#allocation6], %s1589_s19, %s1589_s19, %s1590_s20  }
   0x8   :  { %1581 = dma.done.wait [#allocation3], 256  }
   0x9   :  { %1582 = vsyncadd [#allocation3], 4294967040 }
   0xa   :  { %1583 = dma.done.wait [#allocation6], 8192  }
   0xb   :  { %1584 = vsyncadd [#allocation6], 4294959104  ;;  %v59_v0 = vld [vmem:[#allocation5 + $0x78] sm:$0xff]  ;;  %v58_v1 = vld [vmem:[#allocation5 + $0x70] sm:$0xff]  ;;  %s1591_s0 = smov [#allocation7]   ;;  %s1493_s23 = sshll.u32 %s2634_s2, 4  ;;  %s1494_s23 = int_to_ptr.hbm [resolvable:$true] %s1493_s23 }
   0xc   :  { %v57_v2 = vld [vmem:[#allocation5 + $0x68] sm:$0xff]  ;;  %v1613_v3 = vand.u32 4294901760, %v59_v0  ;;  %v1615_v4 = vand.u32 4294901760, %v58_v1  ;;  %v56_v6 = vld [vmem:[#allocation5 + $0x60] sm:$0xff]  ;;  %v55_v7 = vld [vmem:[#allocation5 + $0x58] sm:$0xff]  ;;  %s1491_s1 = sshll.u32 %s1591_s0, 4  ;;  %s1492_s1 = int_to_ptr.vmem [resolvable:$true] %s1491_s1 }
   0xd   :  { %v1617_v5 = vand.u32 4294901760, %v57_v2  ;;  %v54_v8 = vld [vmem:[#allocation5 + $0x50] sm:$0xff]  ;;  %v1619_v9 = vand.u32 4294901760, %v56_v6  ;;  %v1621_v10 = vand.u32 4294901760, %v55_v7  ;;  %v53_v12 = vld [vmem:[#allocation5 + $0x48] sm:$0xff]  ;;  %v52_v13 = vld [vmem:[#allocation5 + $0x40] sm:$0xff] }
   0xe   :  { %v1623_v11 = vand.u32 4294901760, %v54_v8  ;;  %122 = vmatpush.msra.mxu0 %v1613_v3  ;;  %v1627_v14 = vsub.f32 %v59_v0, %v1613_v3  ;;  %v1630_v15 = vsub.f32 %v58_v1, %v1615_v4  ;;  %318 = vmatpush.msra.mxu3 %v1613_v3  ;;  %v1636_v17 = vand.u32 4294901760, %v53_v12  ;;  %v51_v18 = vld [vmem:[#allocation5 + $0x38] sm:$0xff]  ;;  %v50_v26 = vld [vmem:[#allocation5 + $0x30] sm:$0xff]  ;;  %v49_v34 = vld [vmem:[#allocation5 + $0x28] sm:$0xff] }
   0xf   :  { %v1634_v16 = vsub.f32 %v57_v2, %v1617_v5  ;;  %v1639_v19 = vsub.f32 %v56_v6, %v1619_v9  ;;  %v1642_v20 = vsub.f32 %v55_v7, %v1621_v10  ;;  %v1652_v25 = vand.u32 4294901760, %v52_v13  ;;  %v48_v42 = vld [vmem:[#allocation5 + $0x20] sm:$0xff]  ;;  %v47_v48 = vld [vmem:[#allocation5 + $0x18] sm:$0xff]  ;;  %v46_v54 = vld [vmem:[#allocation5 + $0x10] sm:$0xff] }
  0x10   :  { %v1645_v21 = vsub.f32 %v54_v8, %v1623_v11  ;;  %124 = vmatpush.msra.mxu0 %v1615_v4  ;;  %265 = vmatpush.msra.mxu2 %v1627_v14  ;;  %v164_v22 = vand.u32 4294901760, %v1627_v14  ;;  %v2650_v23 = vand.u32 4294901760, %v1630_v15  ;;  %v1656_v28 = vand.u32 4294901760, %v51_v18  ;;  %v42_v55 = vld [vmem:[#allocation2] sm:$0xff]  ;;  %v75_v60 = vld [vmem:[#allocation5 + $0xf8] sm:$0xff]  ;;  %v45_v62 = vld [vmem:[#allocation5 + $0x8] sm:$0xff] }
  0x11   :  { %v2648_v24 = vand.u32 4294901760, %v1634_v16  ;;  %320 = vmatpush.msra.mxu3 %v1615_v4  ;;  %v2646_v27 = vand.u32 4294901760, %v1639_v19  ;;  %v1659_v29 = vsub.f32 %v53_v12, %v1636_v17  ;;  %v2644_v33 = vand.u32 4294901760, %v1642_v20  ;;  %110 = vst [vmem:[#allocation1] ss:$2 sm:$0xff] %v42_v55  ;;  %v44_v6 = vld [vmem:[#allocation5] sm:$0xff] }
  0x12   :  { %126 = vmatpush.msra.mxu0 %v1617_v5  ;;  %268 = vmatpush.msra.mxu2 %v1630_v15  ;;  %v165_v30 = vsub.f32 %v1627_v14, %v164_v22  ;;  %v171_v31 = vsub.f32 %v1630_v15, %v2650_v23  ;;  %v1674_v35 = vand.u32 4294901760, %v50_v26  ;;  %v2642_v36 = vand.u32 4294901760, %v1645_v21  ;;  %v74_v7 = vld [vmem:[#allocation5 + $0xf0] sm:$0xff] }
  0x13   :  { %v177_v32 = vsub.f32 %v1634_v16, %v2648_v24  ;;  %322 = vmatpush.msra.mxu3 %v1617_v5  ;;  %v183_v39 = vsub.f32 %v1639_v19, %v2646_v27  ;;  %v1683_v40 = vsub.f32 %v52_v13, %v1652_v25  ;;  %v1686_v41 = vand.u32 4294901760, %v49_v34 }
  0x14   :  { %128 = vmatpush.msra.mxu0 %v1619_v9  ;;  %v166_v37 = vand.u32 4294901760, %v165_v30  ;;  %271 = vmatpush.msra.mxu2 %v1634_v16  ;;  %v172_v38 = vand.u32 4294901760, %v171_v31  ;;  %v189_v44 = vsub.f32 %v1642_v20, %v2644_v33  ;;  %v2641_v45 = vand.u32 4294901760, %v1659_v29 }
  0x15   :  { %324 = vmatpush.msra.mxu3 %v1619_v9  ;;  %v178_v43 = vand.u32 4294901760, %v177_v32  ;;  %v1694_v46 = vsub.f32 %v51_v18, %v1656_v28  ;;  %v195_v47 = vsub.f32 %v1645_v21, %v2642_v36  ;;  %v184_v49 = vand.u32 4294901760, %v183_v39 }
  0x16   :  { %130 = vmatpush.msra.mxu0 %v1621_v10  ;;  %167 = vmatpush.msra.mxu1 %v166_v37  ;;  %v1702_v50 = vand.u32 4294901760, %v48_v42  ;;  %v2640_v51 = vand.u32 4294901760, %v1683_v40  ;;  %v1706_v52 = vsub.f32 %v50_v26, %v1674_v35  ;;  %v1711_v53 = vsub.f32 %v49_v34, %v1686_v41  ;;  %v73_v34 = vld [vmem:[#allocation5 + $0xe8] sm:$0xff] }
  0x17   :  { %274 = vmatpush.msra.mxu2 %v1639_v19  ;;  %326 = vmatpush.msra.mxu3 %v1621_v10  ;;  %v190_v56 = vand.u32 4294901760, %v189_v44  ;;  %v201_v57 = vsub.f32 %v1659_v29, %v2641_v45  ;;  %v1717_v58 = vand.u32 4294901760, %v47_v48  ;;  %v2639_v59 = vand.u32 4294901760, %v1694_v46  ;;  %v68_v45 = vld [vmem:[#allocation5 + $0xc0] sm:$0xff] }
  0x18   :  { %132 = vmatpush.msra.mxu0 %v1623_v11  ;;  %173 = vmatpush.msra.mxu1 %v172_v38  ;;  %v196_v61 = vand.u32 4294901760, %v195_v47  ;;  %v207_v63 = vsub.f32 %v1683_v40, %v2640_v51  ;;  %v1726_v0 = vand.u32 4294901760, %v46_v54  ;;  %v2637_v1 = vand.u32 4294901760, %v1706_v52  ;;  %v72_v47 = vld [vmem:[#allocation5 + $0xe0] sm:$0xff] }
  0x19   :  { %277 = vmatpush.msra.mxu2 %v1642_v20  ;;  %328 = vmatpush.msra.mxu3 %v1623_v11  ;;  %v1730_v2 = vsub.f32 %v48_v42, %v1702_v50  ;;  %v2636_v8 = vand.u32 4294901760, %v1711_v53  ;;  %v1735_v12 = vand.u32 4294901760, %v75_v60  ;;  %v202_v13 = vand.u32 4294901760, %v201_v57 }
  0x1a   :  { %134 = vmatpush.msra.mxu0 %v1636_v17  ;;  %179 = vmatpush.msra.mxu1 %v178_v43  ;;  %v213_v18 = vsub.f32 %v1694_v46, %v2639_v59  ;;  %v1741_v26 = vand.u32 4294901760, %v45_v62  ;;  %v1744_v30 = vsub.f32 %v47_v48, %v1717_v58  ;;  %v1748_v31 = vand.u32 4294901760, %v44_v6 }
  0x1b   :  { %280 = vmatpush.msra.mxu2 %v1645_v21  ;;  %330 = vmatpush.msra.mxu3 %v1636_v17  ;;  %v1750_v32 = vand.u32 4294901760, %v74_v7  ;;  %v208_v37 = vand.u32 4294901760, %v207_v63  ;;  %v219_v38 = vsub.f32 %v1706_v52, %v2637_v1  ;;  %v2635_v39 = vand.u32 4294901760, %v1730_v2 }
  0x1c   :  { %136 = vmatpush.msra.mxu0 %v1652_v25  ;;  %185 = vmatpush.msra.mxu1 %v184_v49  ;;  %2674 = vst [vmem:[#allocation11_spill] sm:$0xff] %v1748_v31  ;;  %v1758_v42 = vsub.f32 %v46_v54, %v1726_v0  ;;  %v225_v43 = vsub.f32 %v1711_v53, %v2636_v8  ;;  %v214_v48 = vand.u32 4294901760, %v213_v18  ;;  %v2638_v49 = vand.u32 4294901760, %v1744_v30  ;;  %v70_v18 = vld [vmem:[#allocation5 + $0xd0] sm:$0xff] }
  0x1d   :  { %283 = vmatpush.msra.mxu2 %v1659_v29  ;;  %332 = vmatpush.msra.mxu3 %v1652_v25  ;;  %v1766_v44 = vsub.f32 %v75_v60, %v1735_v12  ;;  %v1771_v54 = vsub.f32 %v45_v62, %v1741_v26  ;;  %v1773_v55 = vand.u32 4294901760, %v73_v34  ;;  %v1781_v57 = vsub.f32 %v74_v7, %v1750_v32  ;;  %v71_v60 = vld [vmem:[#allocation5 + $0xd8] sm:$0xff] }
  0x1e   :  { %138 = vmatpush.msra.mxu0 %v1656_v28  ;;  %191 = vmatpush.msra.mxu1 %v190_v56  ;;  %v1778_v56 = vsub.f32 %v44_v6, %v1748_v31  ;;  %v231_v62 = vsub.f32 %v1730_v2, %v2635_v39  ;;  %v2643_v63 = vand.u32 4294901760, %v1758_v42  ;;  %v226_v6 = vand.u32 4294901760, %v225_v43  ;;  %v69_v43 = vld [vmem:[#allocation5 + $0xc8] sm:$0xff] }
  0x1f   :  { %286 = vmatpush.msra.mxu2 %v1683_v40  ;;  %334 = vmatpush.msra.mxu3 %v1656_v28  ;;  %v2645_v7 = vand.u32 4294901760, %v1766_v44  ;;  %v1799_v39 = vsub.f32 %v73_v34, %v1773_v55  ;;  %v1801_v8 = vand.u32 4294901760, %v71_v60  ;;  %v1814_v51 = vand.u32 4294901760, %v70_v18 }
  0x20   :  { %140 = vmatpush.msra.mxu0 %v1674_v35  ;;  %197 = vmatpush.msra.mxu1 %v196_v61  ;;  %v220_v61 = vand.u32 4294901760, %v219_v38  ;;  %v2647_v38 = vand.u32 4294901760, %v1771_v54  ;;  %v2651_v1 = vand.u32 4294901760, %v1778_v56  ;;  %v243_v34 = vsub.f32 %v1758_v42, %v2643_v63 }
  0x21   :  { %289 = vmatpush.msra.mxu2 %v1694_v46  ;;  %336 = vmatpush.msra.mxu3 %v1674_v35  ;;  %v506_v36 = vsub.f32 %v1766_v44, %v2645_v7  ;;  %v2652_v63 = vand.u32 4294901760, %v1799_v39  ;;  %v1829_v33 = vsub.f32 %v71_v60, %v1801_v8  ;;  %v1836_v27 = vand.u32 4294901760, %v68_v45 }
  0x22   :  { %142 = vmatpush.msra.mxu0 %v1686_v41  ;;  %203 = vmatpush.msra.mxu1 %v202_v13  ;;  %v1788_v13 = vand.u32 4294901760, %v72_v47  ;;  %v255_v60 = vsub.f32 %v1778_v56, %v2651_v1  ;;  %v1844_v24 = vsub.f32 %v70_v18, %v1814_v51  ;;  %v2675_v14 = vand.u32 4294901760, %v1630_v15 }
  0x23   :  { %292 = vmatpush.msra.mxu2 %v1706_v52  ;;  %338 = vmatpush.msra.mxu3 %v1686_v41  ;;  %v518_v1 = vsub.f32 %v1799_v39, %v2652_v63  ;;  %v2677_v15 = vand.u32 4294901760, %v1634_v16  ;;  %v2679_v16 = vand.u32 4294901760, %v1639_v19  ;;  %v2681_v19 = vand.u32 4294901760, %v1642_v20 }
  0x24   :  { %144 = vmatpush.msra.mxu0 %v1702_v50  ;;  %209 = vmatpush.msra.mxu1 %v208_v37  ;;  %v237_v37 = vsub.f32 %v1744_v30, %v2638_v49  ;;  %v232_v49 = vand.u32 4294901760, %v231_v62  ;;  %v1812_v59 = vsub.f32 %v72_v47, %v1788_v13  ;;  %v249_v47 = vsub.f32 %v1771_v54, %v2647_v38 }
  0x25   :  { %295 = vmatpush.msra.mxu2 %v1711_v53  ;;  %340 = vmatpush.msra.mxu3 %v1702_v50  ;;  %v2683_v20 = vand.u32 4294901760, %v1645_v21  ;;  %v2685_v21 = vand.u32 4294901760, %v1659_v29  ;;  %v2687_v29 = vand.u32 4294901760, %v1683_v40  ;;  %v2689_v40 = vand.u32 4294901760, %v1694_v46 }
  0x26   :  { %146 = vmatpush.msra.mxu0 %v1717_v58  ;;  %215 = vmatpush.msra.mxu1 %v214_v48  ;;  %v2649_v48 = vand.u32 4294901760, %v1781_v57  ;;  %v238_v62 = vand.u32 4294901760, %v237_v37  ;;  %v244_v37 = vand.u32 4294901760, %v243_v34  ;;  %v250_v34 = vand.u32 4294901760, %v249_v47 }
  0x27   :  { %298 = vmatpush.msra.mxu2 %v1730_v2  ;;  %342 = vmatpush.msra.mxu3 %v1717_v58  ;;  %v2676_v47 = vand.u32 4294901760, %v1812_v59 }
  0x28   :  { %148 = vmatpush.msra.mxu0 %v1726_v0  ;;  %221 = vmatpush.msra.mxu1 %v220_v61  ;;  %v1821_v61 = vand.u32 4294901760, %v69_v43  ;;  %v512_v7 = vsub.f32 %v1781_v57, %v2649_v48  ;;  %v507_v48 = vand.u32 4294901760, %v506_v36  ;;  %v1863_v36 = vsub.f32 %v68_v45, %v1836_v27 }
  0x29   :  { %301 = vmatpush.msra.mxu2 %v1744_v30  ;;  %344 = vmatpush.msra.mxu3 %v1726_v0  ;;  %v524_v63 = vsub.f32 %v1812_v59, %v2676_v47 }
  0x2a   :  { %150 = vmatpush.msra.mxu0 %v1741_v26  ;;  %227 = vmatpush.msra.mxu1 %v226_v6  ;;  %v67_v6 = vld [vmem:[#allocation5 + $0xb8] sm:$0xff]  ;;  %v1850_v23 = vsub.f32 %v69_v43, %v1821_v61  ;;  %v65_v43 = vld [vmem:[#allocation5 + $0xa8] sm:$0xff] }
  0x2b   :  { %304 = vmatpush.msra.mxu2 %v1758_v42  ;;  %346 = vmatpush.msra.mxu3 %v1741_v26  ;;  %v1857_v38 = vand.u32 4294901760, %v67_v6  ;;  %v1882_v18 = vand.u32 4294901760, %v65_v43 }
  0x2c   :  { %152 = vmatpush.msra.mxu0 %v1748_v31  ;;  %233 = vmatpush.msra.mxu1 %v232_v49  ;;  %v66_v49 = vld [vmem:[#allocation5 + $0xb0] sm:$0xff] }
  0x2d   :  { %307 = vmatpush.msra.mxu2 %v1771_v54  ;;  %348 = vmatpush.msra.mxu3 %v1748_v31  ;;  %v1870_v31 = vand.u32 4294901760, %v66_v49  ;;  %v1880_v47 = vsub.f32 %v67_v6, %v1857_v38 }
  0x2e   :  { %359 = vmatpush.msrb.mxu0 %v164_v22  ;;  %239 = vmatpush.msra.mxu1 %v238_v62  ;;  %v513_v22 = vand.u32 4294901760, %v512_v7  ;;  %v256_v62 = vand.u32 4294901760, %v255_v60  ;;  %v64_v7 = vld [vmem:[#allocation5 + $0xa0] sm:$0xff]  ;;  %v2678_v60 = vand.u32 4294901760, %v1829_v33 }
  0x2f   :  { %310 = vmatpush.msra.mxu2 %v1778_v56  ;;  %508 = vmatpush.msrb.mxu3 %v507_v48  ;;  %v1892_v6 = vsub.f32 %v66_v49, %v1870_v31  ;;  %v1894_v45 = vand.u32 4294901760, %v64_v7  ;;  %v1905_v49 = vsub.f32 %v65_v43, %v1882_v18 }
  0x30   :  { %363 = vmatpush.msrb.mxu0 %v2675_v14  ;;  %245 = vmatpush.msra.mxu1 %v244_v37  ;;  %v519_v37 = vand.u32 4294901760, %v518_v1  ;;  %v530_v14 = vsub.f32 %v1829_v33, %v2678_v60  ;;  %v525_v1 = vand.u32 4294901760, %v524_v63 }
  0x31   :  { %463 = vmatpush.msrb.mxu2 %v1735_v12  ;;  %514 = vmatpush.msrb.mxu3 %v513_v22  ;;  %v2682_v22 = vand.u32 4294901760, %v1850_v23  ;;  %v1918_v43 = vsub.f32 %v64_v7, %v1894_v45 }
  0x32   :  { %367 = vmatpush.msrb.mxu0 %v2677_v15  ;;  %251 = vmatpush.msra.mxu1 %v250_v34  ;;  %v63_v15 = vld [vmem:[#allocation5 + $0x98] sm:$0xff]  ;;  %v2680_v34 = vand.u32 4294901760, %v1844_v24  ;;  %v531_v63 = vand.u32 4294901760, %v530_v14 }
  0x33   :  { %465 = vmatpush.msrb.mxu2 %v1750_v32  ;;  %520 = vmatpush.msrb.mxu3 %v519_v37  ;;  %v1907_v48 = vand.u32 4294901760, %v63_v15 }
  0x34   :  { %371 = vmatpush.msrb.mxu0 %v2679_v16  ;;  %257 = vmatpush.msra.mxu1 %v256_v62  ;;  %v536_v60 = vsub.f32 %v1844_v24, %v2680_v34  ;;  %v542_v62 = vsub.f32 %v1850_v23, %v2682_v22  ;;  %v113_v16 = vld.sshfl [vmem:[#allocation1] sm:$0xff pattern:$0x75316420]  ;;  %v62_v22 = vld [vmem:[#allocation5 + $0x90] sm:$0xff] }
  0x35   :  { %467 = vmatpush.msrb.mxu2 %v1773_v55  ;;  %526 = vmatpush.msrb.mxu3 %v525_v1  ;;  %v1920_v34 = vand.u32 4294901760, %v113_v16  ;;  %v2686_v1 = vand.u32 4294901760, %v1880_v47  ;;  %v1930_v7 = vand.u32 4294901760, %v62_v22  ;;  %v1933_v14 = vsub.f32 %v63_v15, %v1907_v48 }
  0x36   :  { %375 = vmatpush.msrb.mxu0 %v2681_v19  ;;  %426 = vmatpush.msrb.mxu1 %v1613_v3  ;;  %v2684_v3 = vand.u32 4294901760, %v1863_v36  ;;  %v537_v37 = vand.u32 4294901760, %v536_v60 }
  0x37   :  { %469 = vmatpush.msrb.mxu2 %v1788_v13  ;;  %532 = vmatpush.msrb.mxu3 %v531_v63  ;;  %v554_v60 = vsub.f32 %v1880_v47, %v2686_v1  ;;  %v1944_v1 = vsub.f32 %v113_v16, %v1920_v34  ;;  %v1957_v16 = vsub.f32 %v62_v22, %v1930_v7 }
  0x38   :  { %379 = vmatpush.msrb.mxu0 %v2683_v20  ;;  %428 = vmatpush.msrb.mxu1 %v1615_v4  ;;  %v548_v19 = vsub.f32 %v1863_v36, %v2684_v3  ;;  %v543_v4 = vand.u32 4294901760, %v542_v62  ;;  %v61_v20 = vld [vmem:[#allocation5 + $0x88] sm:$0xff]  ;;  %v2688_v62 = vand.u32 4294901760, %v1892_v6  ;;  %v60_v3 = vld [vmem:[#allocation5 + $0x80] sm:$0xff] }
  0x39   :  { %471 = vmatpush.msrb.mxu2 %v1801_v8  ;;  %538 = vmatpush.msrb.mxu3 %v537_v37  ;;  %v1946_v15 = vand.u32 4294901760, %v61_v20  ;;  %v1962_v46 = vand.u32 4294901760, %v60_v3 }
  0x3a   :  { %383 = vmatpush.msrb.mxu0 %v2685_v21  ;;  %430 = vmatpush.msrb.mxu1 %v1617_v5  ;;  %v549_v5 = vand.u32 4294901760, %v548_v19  ;;  %v560_v63 = vsub.f32 %v1892_v6, %v2688_v62  ;;  %v571_v21 = vand.u32 4294901760, %v1918_v43  ;;  %v2690_v19 = vand.u32 4294901760, %v1905_v49 }
  0x3b   :  { %473 = vmatpush.msrb.mxu2 %v1814_v51  ;;  %544 = vmatpush.msrb.mxu3 %v543_v4  ;;  %v2691_v62 = vand.u32 4294901760, %v1706_v52  ;;  %v1970_v22 = vsub.f32 %v61_v20, %v1946_v15  ;;  %v2692_v52 = vand.u32 4294901760, %v1711_v53  ;;  %v1984_v53 = vsub.f32 %v60_v3, %v1962_v46 }
  0x3c   :  { %387 = vmatpush.msrb.mxu0 %v2687_v29  ;;  %432 = vmatpush.msrb.mxu1 %v1619_v9  ;;  %v555_v9 = vand.u32 4294901760, %v554_v60  ;;  %v566_v37 = vsub.f32 %v1905_v49, %v2690_v19  ;;  %v577_v29 = vand.u32 4294901760, %v1933_v14  ;;  %v572_v4 = vsub.f32 %v1918_v43, %v571_v21 }
  0x3d   :  { %475 = vmatpush.msrb.mxu2 %v1821_v61  ;;  %550 = vmatpush.msrb.mxu3 %v549_v5  ;;  %v155_v60 = vand.u32 4294901760, %v1944_v1  ;;  %v2693_v19 = vand.u32 4294901760, %v1730_v2  ;;  %v2695_v3 = vand.u32 4294901760, %v1758_v42  ;;  %v2697_v42 = vand.u32 4294901760, %v1778_v56 }
  0x3e   :  { %391 = vmatpush.msrb.mxu0 %v2689_v40  ;;  %434 = vmatpush.msrb.mxu1 %v1621_v10  ;;  %v561_v10 = vand.u32 4294901760, %v560_v63  ;;  %v567_v5 = vand.u32 4294901760, %v566_v37  ;;  %v578_v63 = vsub.f32 %v1933_v14, %v577_v29  ;;  %v583_v40 = vand.u32 4294901760, %v1957_v16 }
  0x3f   :  { %477 = vmatpush.msrb.mxu2 %v1836_v27  ;;  %556 = vmatpush.msrb.mxu3 %v555_v9  ;;  %v156_v20 = vsub.f32 %v1944_v1, %v155_v60  ;;  %v589_v9 = vand.u32 4294901760, %v1970_v22 }
  0x40   :  { %395 = vmatpush.msrb.mxu0 %v2691_v62  ;;  %436 = vmatpush.msrb.mxu1 %v1623_v11  ;;  %v114_v11 = vld.sshfl [vmem:[#allocation1 + $0x8] sm:$0xff pattern:$0x75316420]  ;;  %v2694_v62 = vand.u32 4294901760, %v1744_v30  ;;  %v584_v2 = vsub.f32 %v1957_v16, %v583_v40 }
  0x41   :  { %479 = vmatpush.msrb.mxu2 %v1857_v38  ;;  %562 = vmatpush.msrb.mxu3 %v561_v10  ;;  %v1989_v37 = vand.u32 4294901760, %v114_v11  ;;  %v595_v10 = vand.u32 4294901760, %v1984_v53  ;;  %v157_v30 = vand.u32 4294901760, %v156_v20 }
  0x42   :  { %399 = vmatpush.msrb.mxu0 %v2692_v52  ;;  %438 = vmatpush.msrb.mxu1 %v1636_v17  ;;  %v573_v17 = vand.u32 4294901760, %v572_v4  ;;  %v2696_v52 = vand.u32 4294901760, %v1771_v54 }
  0x43   :  { %481 = vmatpush.msrb.mxu2 %v1870_v31  ;;  %568 = vmatpush.msrb.mxu3 %v567_v5  ;;  %v2007_v4 = vsub.f32 %v114_v11, %v1989_v37  ;;  %v596_v5 = vsub.f32 %v1984_v53, %v595_v10 }
  0x44   :  { %403 = vmatpush.msrb.mxu0 %v2693_v19  ;;  %440 = vmatpush.msrb.mxu1 %v1652_v25  ;;  %v579_v25 = vand.u32 4294901760, %v578_v63 }
  0x45   :  { %483 = vmatpush.msrb.mxu2 %v1882_v18  ;;  %574 = vmatpush.msrb.mxu3 %v573_v17  ;;  %v496_v11 = vand.u32 4294901760, %v2007_v4 }
  0x46   :  { %407 = vmatpush.msrb.mxu0 %v2694_v62  ;;  %442 = vmatpush.msrb.mxu1 %v1656_v28  ;;  %v590_v28 = vsub.f32 %v1970_v22, %v589_v9 }
  0x47   :  { %485 = vmatpush.msrb.mxu2 %v1894_v45  ;;  %580 = vmatpush.msrb.mxu3 %v579_v25 }
  0x48   :  { %411 = vmatpush.msrb.mxu0 %v2695_v3  ;;  %444 = vmatpush.msrb.mxu1 %v1674_v35  ;;  %v585_v35 = vand.u32 4294901760, %v584_v2  ;;  %v591_v54 = vand.u32 4294901760, %v590_v28 }
  0x49   :  { %487 = vmatpush.msrb.mxu2 %v1907_v48  ;;  %158 = vmatmul.f32.vlgmr.msra.gmra.mxu0 %v157_v30 }
  0x4a   :  { %415 = vmatpush.msrb.mxu0 %v2696_v52  ;;  %446 = vmatpush.msrb.mxu1 %v1686_v41  ;;  %v597_v41 = vand.u32 4294901760, %v596_v5 }
  0x4b   :  { %489 = vmatpush.msrb.mxu2 %v1930_v7  ;;  %586 = vmatpush.msrb.mxu3 %v585_v35  ;;  %v80_v35 = vld [vmem:[#allocation5 + $0x120] sm:$0xff] }
  0x4c   :  { %419 = vmatpush.msrb.mxu0 %v2697_v42  ;;  %448 = vmatpush.msrb.mxu1 %v1702_v50  ;;  %v497_v50 = vsub.f32 %v2007_v4, %v496_v11 }
  0x4d   :  { %491 = vmatpush.msrb.mxu2 %v1946_v15  ;;  %592 = vmatpush.msrb.mxu3 %v591_v54 }
  0x4e   :  { %606 = vmatpush.msra.mxu0 %v1766_v44  ;;  %450 = vmatpush.msrb.mxu1 %v1717_v58  ;;  %v2698_v58 = vand.u32 4294901760, %v1766_v44  ;;  %v498_v56 = vand.u32 4294901760, %v497_v50  ;;  %v2701_v44 = vand.u32 4294901760, %v1799_v39  ;;  %v79_v50 = vld [vmem:[#allocation5 + $0x118] sm:$0xff] }
  0x4f   :  { %313 = vmatmul.f32.vlgmr.msra.gmra.mxu2 %v1944_v1  ;;  %352 = vmatmul.f32.vlgmr.msra.gmra.mxu3 %v155_v60  ;;  %v2700_v1 = vld [vmem:[#allocation11_spill] sm:$0xff] }
  0x50   :  { %609 = vmatpush.msra.mxu0 %v1781_v57  ;;  %452 = vmatpush.msrb.mxu1 %v1726_v0  ;;  %v2699_v0 = vand.u32 4294901760, %v1781_v57  ;;  %v89_v57 = vld [vmem:[#allocation5 + $0x168] sm:$0xff] }
  0x51   :  { %493 = vmatpush.msrb.mxu2 %v1962_v46  ;;  %598 = vmatpush.msrb.mxu3 %v597_v41 }
  0x52   :  { %612 = vmatpush.msra.mxu0 %v1799_v39  ;;  %454 = vmatpush.msrb.mxu1 %v1741_v26  ;;  %v2702_v26 = vand.u32 4294901760, %v1812_v59  ;;  %v2707_v39 = vand.u32 4294901760, %v1880_v47 }
  0x53   :  { %700 = vmatpush.msra.mxu2 %v2698_v58  ;;  %259 = vmatmul.f32.vlgmr.msra.gmra.mxu1 %v1920_v34 }
  0x54   :  { %615 = vmatpush.msra.mxu0 %v1812_v59  ;;  %767 = vmatpush.msra.mxu3 %v1735_v12  ;;  %v2704_v59 = vand.u32 4294901760, %v1844_v24 }
  0x55   :  { %704 = vmatpush.msra.mxu2 %v2699_v0  ;;  %456 = vmatpush.msrb.mxu1 %v2700_v1  ;;  %v2206_v0 = vand.u32 4294901760, %v80_v35 }
  0x56   :  { %618 = vmatpush.msra.mxu0 %v1829_v33  ;;  %769 = vmatpush.msra.mxu3 %v1750_v32 }
  0x57   :  { %659 = vmatpush.msra.mxu1 %v1735_v12  ;;  %708 = vmatpush.msra.mxu2 %v2701_v44  ;;  %v2703_v12 = vand.u32 4294901760, %v1829_v33  ;;  %v2705_v33 = vand.u32 4294901760, %v1850_v23 }
  0x58   :  { %499 = vmatmul.f32.vlgmr.msrb.gmra.mxu2 %v498_v56  ;;  %621 = vmatpush.msra.mxu0 %v1844_v24  ;;  %v2706_v24 = vand.u32 4294901760, %v1863_v36 }
  0x59   :  { %661 = vmatpush.msra.mxu1 %v1750_v32  ;;  %712 = vmatpush.msra.mxu2 %v2702_v26  ;;  %v43_v32 = vld [vmem:[#allocation2 + $0x8] sm:$0xff]  ;;  %v78_v26 = vld [vmem:[#allocation5 + $0x110] sm:$0xff] }
  0x5a   :  { %771 = vmatpush.msra.mxu3 %v1773_v55  ;;  %421 = vmatmul.f32.vlgmr.msrb.gmra.mxu0 %v1920_v34  ;;  %112 = vst [vmem:[#allocation1 + $0x10] ss:$2 sm:$0xff] %v43_v32  ;;  %v2220_v32 = vand.u32 4294901760, %v79_v50 }
  0x5b   :  { %600 = vmatmul.f32.vlgmr.msrb.gmra.mxu3 %v1989_v37  ;;  %624 = vmatpush.msra.mxu0 %v1850_v23  ;;  %v90_v23 = vld [vmem:[#allocation5 + $0x170] sm:$0xff] }
  0x5c   :  { %663 = vmatpush.msra.mxu1 %v1773_v55  ;;  %716 = vmatpush.msra.mxu2 %v2703_v12 }
  0x5d   :  { %773 = vmatpush.msra.mxu3 %v1788_v13  ;;  %458 = vmatmul.f32.vlgmr.msrb.gmra.mxu1 %v1920_v34  ;;  %v86_v34 = vld [vmem:[#allocation5 + $0x150] sm:$0xff] }
  0x5e   :  { %627 = vmatpush.msra.mxu0 %v1863_v36  ;;  %665 = vmatpush.msra.mxu1 %v1788_v13  ;;  %v2709_v13 = vand.u32 4294901760, %v1905_v49  ;;  %v2097_v36 = vand.u32 4294901760, %v89_v57 }
  0x5f   :  { %720 = vmatpush.msra.mxu2 %v2704_v59  ;;  %775 = vmatpush.msra.mxu3 %v1801_v8 }
  0x60   :  { %630 = vmatpush.msra.mxu0 %v1880_v47  ;;  %667 = vmatpush.msra.mxu1 %v1801_v8  ;;  %v91_v8 = vld [vmem:[#allocation5 + $0x178] sm:$0xff] }
  0x61   :  { %724 = vmatpush.msra.mxu2 %v2705_v33  ;;  %777 = vmatpush.msra.mxu3 %v1814_v51  ;;  %v2083_v55 = vand.u32 4294901760, %v91_v8  ;;  %v87_v47 = vld [vmem:[#allocation5 + $0x158] sm:$0xff] }
  0x62   :  { %633 = vmatpush.msra.mxu0 %v1892_v6  ;;  %669 = vmatpush.msra.mxu1 %v1814_v51  ;;  %v2708_v51 = vand.u32 4294901760, %v1892_v6 }
  0x63   :  { %728 = vmatpush.msra.mxu2 %v2706_v24  ;;  %779 = vmatpush.msra.mxu3 %v1821_v61 }
  0x64   :  { %636 = vmatpush.msra.mxu0 %v1905_v49  ;;  %671 = vmatpush.msra.mxu1 %v1821_v61  ;;  %v2090_v61 = vand.u32 4294901760, %v90_v23  ;;  %v2114_v49 = vand.u32 4294901760, %v87_v47 }
  0x65   :  { %732 = vmatpush.msra.mxu2 %v2707_v39  ;;  %781 = vmatpush.msra.mxu3 %v1836_v27 }
  0x66   :  { %639 = vmatpush.msra.mxu0 %v1918_v43  ;;  %673 = vmatpush.msra.mxu1 %v1836_v27  ;;  %v88_v27 = vld [vmem:[#allocation5 + $0x160] sm:$0xff]  ;;  %v2110_v6 = vsub.f32 %v90_v23, %v2090_v61  ;;  %v2125_v43 = vand.u32 4294901760, %v86_v34  ;;  %v2232_v23 = vand.u32 4294901760, %v78_v26 }
  0x67   :  { %736 = vmatpush.msra.mxu2 %v2708_v51  ;;  %783 = vmatpush.msra.mxu3 %v1857_v38 }
  0x68   :  { %642 = vmatpush.msra.mxu0 %v1933_v14  ;;  %675 = vmatpush.msra.mxu1 %v1857_v38  ;;  %v2100_v38 = vsub.f32 %v91_v8, %v2083_v55  ;;  %v2121_v14 = vsub.f32 %v89_v57, %v2097_v36  ;;  %v2236_v57 = vsub.f32 %v80_v35, %v2206_v0 }
  0x69   :  { %740 = vmatpush.msra.mxu2 %v2709_v13  ;;  %785 = vmatpush.msra.mxu3 %v1870_v31  ;;  %v77_v13 = vld [vmem:[#allocation5 + $0x108] sm:$0xff] }
  0x6a   :  { %645 = vmatpush.msra.mxu0 %v1957_v16  ;;  %677 = vmatpush.msra.mxu1 %v1870_v31  ;;  %v2107_v31 = vand.u32 4294901760, %v88_v27  ;;  %v2137_v16 = vsub.f32 %v87_v47, %v2114_v49  ;;  %v858_v63 = vand.u32 4294901760, %v2121_v14 }
  0x6b   :  { %744 = vmatpush.msra.mxu2 %v571_v21  ;;  %787 = vmatpush.msra.mxu3 %v1882_v18  ;;  %v85_v21 = vld [vmem:[#allocation5 + $0x148] sm:$0xff] }
  0x6c   :  { %648 = vmatpush.msra.mxu0 %v1970_v22  ;;  %679 = vmatpush.msra.mxu1 %v1882_v18  ;;  %v846_v18 = vand.u32 4294901760, %v2100_v38  ;;  %v2145_v22 = vand.u32 4294901760, %v85_v21  ;;  %v2663_v20 = vand.u32 4294901760, %v2137_v16  ;;  %v859_v25 = vsub.f32 %v2121_v14, %v858_v63 }
  0x6d   :  { %748 = vmatpush.msra.mxu2 %v577_v29  ;;  %789 = vmatpush.msra.mxu3 %v1894_v45  ;;  %v2132_v29 = vsub.f32 %v88_v27, %v2107_v31 }
  0x6e   :  { %651 = vmatpush.msra.mxu0 %v1984_v53  ;;  %681 = vmatpush.msra.mxu1 %v1894_v45  ;;  %v852_v45 = vand.u32 4294901760, %v2110_v6  ;;  %v847_v60 = vsub.f32 %v2100_v38, %v846_v18  ;;  %v2172_v3 = vsub.f32 %v85_v21, %v2145_v22  ;;  %v860_v42 = vand.u32 4294901760, %v859_v25 }
  0x6f   :  { %752 = vmatpush.msra.mxu2 %v583_v40  ;;  %791 = vmatpush.msra.mxu3 %v1907_v48  ;;  %v83_v40 = vld [vmem:[#allocation5 + $0x138] sm:$0xff]  ;;  %v2666_v17 = vand.u32 4294901760, %v2132_v29  ;;  %v2654_v25 = vand.u32 4294901760, %v2236_v57 }
  0x70   :  { %654 = vmatmul.f32.vlgmr.msra.gmra.mxu0 %v2007_v4  ;;  %683 = vmatpush.msra.mxu1 %v1907_v48  ;;  %v84_v48 = vld [vmem:[#allocation5 + $0x140] sm:$0xff]  ;;  %v853_v19 = vsub.f32 %v2110_v6, %v852_v45  ;;  %v848_v62 = vand.u32 4294901760, %v847_v60  ;;  %v2169_v2 = vand.u32 4294901760, %v83_v40  ;;  %v2660_v54 = vand.u32 4294901760, %v2172_v3  ;;  %v107_v60 = vld [vmem:[#allocation5 + $0x1f8] sm:$0xff] }
  0x71   :  { %804 = vmatpush.msrb.mxu0 %v2083_v55  ;;  %756 = vmatpush.msra.mxu2 %v589_v9  ;;  %v2158_v53 = vand.u32 4294901760, %v84_v48  ;;  %v82_v9 = vld [vmem:[#allocation5 + $0x130] sm:$0xff]  ;;  %v865_v30 = vsub.f32 %v2132_v29, %v2666_v17  ;;  %v115_v4 = vld.sshfl [vmem:[#allocation1 + $0x10] sm:$0xff pattern:$0x75316420] }
  0x72   :  { %793 = vmatpush.msra.mxu3 %v1930_v7  ;;  %685 = vmatpush.msra.mxu1 %v1930_v7  ;;  %v2151_v7 = vsub.f32 %v86_v34, %v2125_v43  ;;  %v2182_v28 = vand.u32 4294901760, %v82_v9  ;;  %v2198_v41 = vsub.f32 %v83_v40, %v2169_v2  ;;  %v2214_v12 = vand.u32 4294901760, %v115_v4  ;;  %v99_v17 = vld [vmem:[#allocation5 + $0x1b8] sm:$0xff] }
  0x73   :  { %806 = vmatpush.msrb.mxu0 %v2090_v61  ;;  %760 = vmatpush.msra.mxu2 %v595_v10  ;;  %v81_v10 = vld [vmem:[#allocation5 + $0x128] sm:$0xff]  ;;  %v2185_v52 = vsub.f32 %v84_v48, %v2158_v53  ;;  %v866_v58 = vand.u32 4294901760, %v865_v30  ;;  %v883_v59 = vsub.f32 %v2172_v3, %v2660_v54  ;;  %v2249_v48 = vsub.f32 %v79_v50, %v2220_v32 }
  0x74   :  { %795 = vmatpush.msra.mxu3 %v1946_v15  ;;  %762 = vmatmul.f32.vlgmr.msra.gmra.mxu2 %v1989_v37  ;;  %v2194_v5 = vand.u32 4294901760, %v81_v10  ;;  %v2210_v1 = vsub.f32 %v82_v9, %v2182_v28  ;;  %v2658_v33 = vand.u32 4294901760, %v2198_v41  ;;  %v2241_v27 = vsub.f32 %v115_v4, %v2214_v12 }
  0x75   :  { %808 = vmatpush.msrb.mxu0 %v2097_v36  ;;  %947 = vmatpush.msrb.mxu2 %v2100_v38  ;;  %v2659_v56 = vand.u32 4294901760, %v2185_v52  ;;  %v884_v47 = vand.u32 4294901760, %v883_v59  ;;  %v2253_v40 = vand.u32 4294901760, %v77_v13  ;;  %v2266_v30 = vand.u32 4294901760, %v107_v60 }
  0x76   :  { %687 = vmatpush.msra.mxu1 %v1946_v15  ;;  %797 = vmatpush.msra.mxu3 %v1962_v46  ;;  %v2662_v15 = vand.u32 4294901760, %v2151_v7  ;;  %v2224_v24 = vsub.f32 %v81_v10, %v2194_v5  ;;  %v2657_v51 = vand.u32 4294901760, %v2210_v1  ;;  %v895_v34 = vsub.f32 %v2198_v41, %v2658_v33 }
  0x77   :  { %799 = vmatmul.f32.vlgmr.msra.gmra.mxu3 %v1989_v37  ;;  %810 = vmatpush.msrb.mxu0 %v2107_v31  ;;  %v854_v37 = vand.u32 4294901760, %v853_v19  ;;  %v889_v39 = vsub.f32 %v2185_v52, %v2659_v56  ;;  %v76_v19 = vld [vmem:[#allocation5 + $0x100] sm:$0xff]  ;;  %v2261_v10 = vsub.f32 %v78_v26, %v2232_v23  ;;  %v2278_v50 = vsub.f32 %v77_v13, %v2253_v40 }
  0x78   :  { %950 = vmatpush.msrb.mxu2 %v2110_v6  ;;  %1000 = vmatpush.msrb.mxu3 %v2083_v55  ;;  %v2655_v21 = vand.u32 4294901760, %v2224_v24  ;;  %v896_v35 = vand.u32 4294901760, %v895_v34  ;;  %v2272_v4 = vand.u32 4294901760, %v76_v19  ;;  %v913_v26 = vsub.f32 %v2236_v57, %v2654_v25 }
  0x79   :  { %689 = vmatpush.msra.mxu1 %v1962_v46  ;;  %812 = vmatpush.msrb.mxu0 %v2114_v49  ;;  %v871_v46 = vsub.f32 %v2137_v16, %v2663_v20  ;;  %v890_v9 = vand.u32 4294901760, %v889_v39  ;;  %v2661_v59 = vand.u32 4294901760, %v2261_v10  ;;  %v104_v39 = vld [vmem:[#allocation5 + $0x1e0] sm:$0xff] }
  0x7a   :  { %693 = vmatmul.f32.vlgmr.msra.gmra.mxu1 %v496_v11  ;;  %953 = vmatpush.msrb.mxu2 %v2121_v14  ;;  %v877_v11 = vsub.f32 %v2151_v7, %v2662_v15 }
  0x7b   :  { %849 = vmatpush.msrb.mxu1 %v848_v62  ;;  %1002 = vmatpush.msrb.mxu3 %v2090_v61  ;;  %v872_v44 = vand.u32 4294901760, %v871_v46  ;;  %v901_v62 = vsub.f32 %v2210_v1, %v2657_v51  ;;  %v106_v46 = vld [vmem:[#allocation5 + $0x1f0] sm:$0xff] }
  0x7c   :  { %814 = vmatpush.msrb.mxu0 %v2125_v43  ;;  %956 = vmatpush.msrb.mxu2 %v2132_v29  ;;  %v878_v8 = vand.u32 4294901760, %v877_v11  ;;  %v2656_v11 = vand.u32 4294901760, %v2249_v48 }
  0x7d   :  { %855 = vmatpush.msrb.mxu1 %v854_v37  ;;  %1004 = vmatpush.msrb.mxu3 %v2097_v36  ;;  %v2668_v37 = vand.u32 4294901760, %v2241_v27 }
  0x7e   :  { %816 = vmatpush.msrb.mxu0 %v2145_v22  ;;  %959 = vmatpush.msrb.mxu2 %v2137_v16 }
  0x7f   :  { %861 = vmatpush.msrb.mxu1 %v860_v42  ;;  %1006 = vmatpush.msrb.mxu3 %v2107_v31  ;;  %v907_v42 = vsub.f32 %v2224_v24, %v2655_v21  ;;  %v838_v13 = vsub.f32 %v2241_v27, %v2668_v37  ;;  %v103_v21 = vld [vmem:[#allocation5 + $0x1d8] sm:$0xff]  ;;  %v98_v37 = vld [vmem:[#allocation5 + $0x1b0] sm:$0xff] }
  0x80   :  { %818 = vmatpush.msrb.mxu0 %v2158_v53  ;;  %962 = vmatpush.msrb.mxu2 %v2151_v7  ;;  %v2319_v56 = vand.u32 4294901760, %v103_v21 }
  0x81   :  { %867 = vmatpush.msrb.mxu1 %v866_v58  ;;  %1008 = vmatpush.msrb.mxu3 %v2114_v49  ;;  %v105_v58 = vld [vmem:[#allocation5 + $0x1e8] sm:$0xff]  ;;  %v908_v34 = vand.u32 4294901760, %v907_v42  ;;  %v914_v42 = vand.u32 4294901760, %v913_v26  ;;  %v839_v51 = vand.u32 4294901760, %v838_v13 }
  0x82   :  { %820 = vmatpush.msrb.mxu0 %v2169_v2  ;;  %965 = vmatpush.msrb.mxu2 %v2172_v3  ;;  %v2302_v25 = vand.u32 4294901760, %v105_v58 }
  0x83   :  { %873 = vmatpush.msrb.mxu1 %v872_v44  ;;  %1010 = vmatpush.msrb.mxu3 %v2125_v43  ;;  %v902_v44 = vand.u32 4294901760, %v901_v62  ;;  %v2300_v62 = vsub.f32 %v76_v19, %v2272_v4  ;;  %v925_v19 = vsub.f32 %v2261_v10, %v2661_v59 }
  0x84   :  { %822 = vmatpush.msrb.mxu0 %v2182_v28  ;;  %968 = vmatpush.msrb.mxu2 %v2185_v52  ;;  %v2324_v59 = vsub.f32 %v105_v58, %v2302_v25 }
  0x85   :  { %879 = vmatpush.msrb.mxu1 %v878_v8  ;;  %1012 = vmatpush.msrb.mxu3 %v2145_v22  ;;  %v2285_v8 = vand.u32 4294901760, %v106_v46  ;;  %v2667_v54 = vand.u32 4294901760, %v2300_v62 }
  0x86   :  { %824 = vmatpush.msrb.mxu0 %v2194_v5  ;;  %971 = vmatpush.msrb.mxu2 %v2198_v41 }
  0x87   :  { %885 = vmatpush.msrb.mxu1 %v884_v47  ;;  %1014 = vmatpush.msrb.mxu3 %v2158_v53  ;;  %v2293_v47 = vsub.f32 %v107_v60, %v2266_v30  ;;  %v2664_v60 = vand.u32 4294901760, %v2278_v50 }
  0x88   :  { %826 = vmatpush.msrb.mxu0 %v2206_v0  ;;  %974 = vmatpush.msrb.mxu2 %v2210_v1 }
  0x89   :  { %891 = vmatpush.msrb.mxu1 %v890_v9  ;;  %1016 = vmatpush.msrb.mxu3 %v2169_v2  ;;  %v919_v9 = vsub.f32 %v2249_v48, %v2656_v11  ;;  %v2314_v11 = vsub.f32 %v106_v46, %v2285_v8  ;;  %v2665_v33 = vand.u32 4294901760, %v2293_v47  ;;  %v931_v46 = vsub.f32 %v2278_v50, %v2664_v60 }
  0x8a   :  { %828 = vmatpush.msrb.mxu0 %v2220_v32  ;;  %977 = vmatpush.msrb.mxu2 %v2224_v24  ;;  %v2343_v60 = vsub.f32 %v103_v21, %v2319_v56 }
  0x8b   :  { %897 = vmatpush.msrb.mxu1 %v896_v35  ;;  %1018 = vmatpush.msrb.mxu3 %v2182_v28  ;;  %v2307_v35 = vand.u32 4294901760, %v104_v39  ;;  %v920_v26 = vand.u32 4294901760, %v919_v9  ;;  %v926_v9 = vand.u32 4294901760, %v925_v19  ;;  %v2670_v15 = vand.u32 4294901760, %v2314_v11 }
  0x8c   :  { %830 = vmatpush.msrb.mxu0 %v2232_v23  ;;  %980 = vmatpush.msrb.mxu2 %v2236_v57  ;;  %v1188_v20 = vsub.f32 %v2293_v47, %v2665_v33  ;;  %v932_v33 = vand.u32 4294901760, %v931_v46 }
  0x8d   :  { %903 = vmatpush.msrb.mxu1 %v902_v44  ;;  %1020 = vmatpush.msrb.mxu3 %v2194_v5  ;;  %v102_v44 = vld [vmem:[#allocation5 + $0x1d0] sm:$0xff]  ;;  %v2332_v13 = vsub.f32 %v104_v39, %v2307_v35  ;;  %v100_v39 = vld [vmem:[#allocation5 + $0x1c0] sm:$0xff]  ;;  %v1194_v38 = vsub.f32 %v2314_v11, %v2670_v15 }
  0x8e   :  { %832 = vmatpush.msrb.mxu0 %v2253_v40  ;;  %983 = vmatpush.msrb.mxu2 %v2249_v48  ;;  %v2336_v58 = vand.u32 4294901760, %v102_v44  ;;  %v1189_v46 = vand.u32 4294901760, %v1188_v20  ;;  %v2710_v20 = vand.u32 4294901760, %v2241_v27 }
  0x8f   :  { %909 = vmatpush.msrb.mxu1 %v908_v34  ;;  %1022 = vmatpush.msrb.mxu3 %v2206_v0  ;;  %v101_v34 = vld [vmem:[#allocation5 + $0x1c8] sm:$0xff]  ;;  %v2671_v21 = vand.u32 4294901760, %v2332_v13 }
  0x90   :  { %834 = vmatpush.msrb.mxu0 %v2272_v4  ;;  %986 = vmatpush.msrb.mxu2 %v2261_v10  ;;  %v2351_v19 = vand.u32 4294901760, %v101_v34 }
  0x91   :  { %915 = vmatpush.msrb.mxu1 %v914_v42  ;;  %1024 = vmatpush.msrb.mxu3 %v2220_v32  ;;  %v937_v42 = vsub.f32 %v2300_v62, %v2667_v54  ;;  %v2672_v54 = vand.u32 4294901760, %v2343_v60  ;;  %v1206_v14 = vsub.f32 %v2332_v13, %v2671_v21 }
  0x92   :  { %840 = vmatmul.f32.vlgmr.msrb.gmra.mxu0 %v839_v51  ;;  %989 = vmatpush.msrb.mxu2 %v2278_v50  ;;  %v2669_v51 = vand.u32 4294901760, %v2324_v59 }
  0x93   :  { %1041 = vmatpush.msra.mxu0 %v846_v18  ;;  %921 = vmatpush.msrb.mxu1 %v920_v26  ;;  %v2362_v18 = vsub.f32 %v102_v44, %v2336_v58  ;;  %v2364_v26 = vand.u32 4294901760, %v100_v39  ;;  %v938_v6 = vand.u32 4294901760, %v937_v42  ;;  %v2376_v44 = vsub.f32 %v101_v34, %v2351_v19  ;;  %v95_v34 = vld [vmem:[#allocation5 + $0x198] sm:$0xff] }
  0x94   :  { %1026 = vmatpush.msrb.mxu3 %v2232_v23  ;;  %992 = vmatpush.msrb.mxu2 %v2300_v62  ;;  %v2711_v42 = vand.u32 4294901760, %v2132_v29  ;;  %v1212_v21 = vsub.f32 %v2343_v60, %v2672_v54  ;;  %v2712_v29 = vand.u32 4294901760, %v2137_v16  ;;  %v2714_v54 = vand.u32 4294901760, %v2151_v7 }
  0x95   :  { %1045 = vmatpush.msra.mxu0 %v852_v45  ;;  %927 = vmatpush.msrb.mxu1 %v926_v9  ;;  %v1200_v45 = vsub.f32 %v2324_v59, %v2669_v51  ;;  %v2378_v9 = vand.u32 4294901760, %v99_v17  ;;  %v1195_v51 = vand.u32 4294901760, %v1194_v38  ;;  %v2390_v15 = vsub.f32 %v100_v39, %v2364_v26 }
  0x96   :  { %1028 = vmatpush.msrb.mxu3 %v2253_v40  ;;  %995 = vmatmul.f32.vlgmr.msrb.gmra.mxu2 %v2241_v27  ;;  %v96_v27 = vld [vmem:[#allocation5 + $0x1a0] sm:$0xff]  ;;  %v2713_v16 = vand.u32 4294901760, %v2362_v18  ;;  %v2715_v7 = vand.u32 4294901760, %v2172_v3  ;;  %v2717_v3 = vand.u32 4294901760, %v2185_v52  ;;  %v2719_v52 = vand.u32 4294901760, %v2198_v41 }
  0x97   :  { %1049 = vmatpush.msra.mxu0 %v858_v63  ;;  %1145 = vmatpush.msra.mxu2 %v2266_v30  ;;  %v97_v63 = vld [vmem:[#allocation5 + $0x1a8] sm:$0xff]  ;;  %v1201_v38 = vand.u32 4294901760, %v1200_v45  ;;  %v2402_v39 = vsub.f32 %v99_v17, %v2378_v9  ;;  %v94_v45 = vld [vmem:[#allocation5 + $0x190] sm:$0xff] }
  0x98   :  { %933 = vmatpush.msrb.mxu1 %v932_v33  ;;  %1030 = vmatpush.msrb.mxu3 %v2272_v4  ;;  %v2392_v33 = vand.u32 4294901760, %v98_v37 }
  0x99   :  { %1034 = vmatmul.f32.vlgmr.msrb.gmra.mxu3 %v2710_v20  ;;  %1053 = vmatpush.msra.mxu0 %v2711_v42  ;;  %v2673_v20 = vand.u32 4294901760, %v2376_v44  ;;  %v2404_v42 = vand.u32 4294901760, %v97_v63 }
  0x9a   :  { %1147 = vmatpush.msra.mxu2 %v2285_v8  ;;  %1190 = vmatpush.msra.mxu3 %v1189_v46  ;;  %v1207_v46 = vand.u32 4294901760, %v1206_v14  ;;  %v2414_v17 = vsub.f32 %v98_v37, %v2392_v33  ;;  %v1213_v14 = vand.u32 4294901760, %v1212_v21 }
  0x9b   :  { %939 = vmatpush.msrb.mxu1 %v938_v6  ;;  %1057 = vmatpush.msra.mxu0 %v2712_v29  ;;  %v1218_v6 = vsub.f32 %v2362_v18, %v2713_v16  ;;  %v2416_v29 = vand.u32 4294901760, %v96_v27  ;;  %v2427_v37 = vsub.f32 %v97_v63, %v2404_v42  ;;  %v2429_v16 = vand.u32 4294901760, %v95_v34 }
  0x9c   :  { %941 = vmatmul.f32.vlgmr.msrb.gmra.mxu1 %v2214_v12  ;;  %1149 = vmatpush.msra.mxu2 %v2302_v25 }
  0x9d   :  { %1108 = vmatpush.msra.mxu1 %v2083_v55  ;;  %1196 = vmatpush.msra.mxu3 %v1195_v51  ;;  %v1224_v55 = vsub.f32 %v2376_v44, %v2673_v20  ;;  %v2440_v63 = vsub.f32 %v96_v27, %v2416_v29  ;;  %v93_v20 = vld [vmem:[#allocation5 + $0x188] sm:$0xff]  ;;  %v116_v51 = vld.sshfl [vmem:[#allocation1 + $0x18] sm:$0xff pattern:$0x75316420]  ;;  %v2721_v27 = vand.u32 4294901760, %v2210_v1  ;;  %v2723_v1 = vand.u32 4294901760, %v2224_v24 }
  0x9e   :  { %1061 = vmatpush.msra.mxu0 %v2714_v54  ;;  %1151 = vmatpush.msra.mxu2 %v2307_v35  ;;  %v2716_v54 = vand.u32 4294901760, %v2390_v15 }
  0x9f   :  { %1110 = vmatpush.msra.mxu1 %v2090_v61  ;;  %1202 = vmatpush.msra.mxu3 %v1201_v38  ;;  %v1219_v61 = vand.u32 4294901760, %v1218_v6  ;;  %v92_v38 = vld [vmem:[#allocation5 + $0x180] sm:$0xff] }
  0xa0   :  { %1065 = vmatpush.msra.mxu0 %v2715_v7  ;;  %1153 = vmatpush.msra.mxu2 %v2319_v56  ;;  %v1230_v21 = vsub.f32 %v2390_v15, %v2716_v54  ;;  %v2445_v7 = vand.u32 4294901760, %v94_v45  ;;  %v2453_v54 = vsub.f32 %v95_v34, %v2429_v16  ;;  %v1253_v34 = vand.u32 4294901760, %v2440_v63 }
  0xa1   :  { %1112 = vmatpush.msra.mxu1 %v2097_v36  ;;  %1208 = vmatpush.msra.mxu3 %v1207_v46  ;;  %v1225_v36 = vand.u32 4294901760, %v1224_v55  ;;  %v2718_v46 = vand.u32 4294901760, %v2402_v39  ;;  %v2720_v55 = vand.u32 4294901760, %v2414_v17 }
  0xa2   :  { %1069 = vmatpush.msra.mxu0 %v2717_v3  ;;  %1155 = vmatpush.msra.mxu2 %v2336_v58  ;;  %v2458_v3 = vand.u32 4294901760, %v93_v20  ;;  %v2471_v41 = vsub.f32 %v94_v45, %v2445_v7 }
  0xa3   :  { %1114 = vmatpush.msra.mxu1 %v2107_v31  ;;  %1214 = vmatpush.msra.mxu3 %v1213_v14  ;;  %v1236_v6 = vsub.f32 %v2402_v39, %v2718_v46  ;;  %v2460_v31 = vand.u32 4294901760, %v116_v51  ;;  %v1231_v14 = vand.u32 4294901760, %v1230_v21  ;;  %v1242_v46 = vsub.f32 %v2414_v17, %v2720_v55 }
  0xa4   :  { %1073 = vmatpush.msra.mxu0 %v2719_v52  ;;  %1157 = vmatpush.msra.mxu2 %v2351_v19  ;;  %v2473_v52 = vand.u32 4294901760, %v92_v38  ;;  %v1259_v55 = vand.u32 4294901760, %v2453_v54  ;;  %v2484_v45 = vsub.f32 %v93_v20, %v2458_v3  ;;  %v1265_v24 = vand.u32 4294901760, %v2471_v41 }
  0xa5   :  { %1116 = vmatpush.msra.mxu1 %v2114_v49  ;;  %1220 = vmatpush.msra.mxu3 %v1219_v61  ;;  %v1237_v49 = vand.u32 4294901760, %v1236_v6  ;;  %v2722_v61 = vand.u32 4294901760, %v2427_v37  ;;  %v2724_v6 = vand.u32 4294901760, %v2236_v57 }
  0xa6   :  { %1077 = vmatpush.msra.mxu0 %v2721_v27  ;;  %1159 = vmatpush.msra.mxu2 %v2364_v26  ;;  %v2487_v27 = vsub.f32 %v116_v51, %v2460_v31  ;;  %v2498_v20 = vsub.f32 %v92_v38, %v2473_v52  ;;  %v1260_v51 = vsub.f32 %v2453_v54, %v1259_v55  ;;  %v1271_v57 = vand.u32 4294901760, %v2484_v45 }
  0xa7   :  { %1118 = vmatpush.msra.mxu1 %v2125_v43  ;;  %1226 = vmatpush.msra.mxu3 %v1225_v36  ;;  %v1248_v21 = vsub.f32 %v2427_v37, %v2722_v61  ;;  %v1243_v43 = vand.u32 4294901760, %v1242_v46  ;;  %v1254_v36 = vsub.f32 %v2440_v63, %v1253_v34 }
  0xa8   :  { %1081 = vmatpush.msra.mxu0 %v2723_v1  ;;  %1161 = vmatpush.msra.mxu2 %v2378_v9  ;;  %v1178_v46 = vand.u32 4294901760, %v2487_v27  ;;  %v1261_v61 = vand.u32 4294901760, %v1260_v51 }
  0xa9   :  { %1120 = vmatpush.msra.mxu1 %v2145_v22  ;;  %1232 = vmatpush.msra.mxu3 %v1231_v14  ;;  %v1249_v22 = vand.u32 4294901760, %v1248_v21  ;;  %v2725_v14 = vand.u32 4294901760, %v2249_v48  ;;  %v1255_v38 = vand.u32 4294901760, %v1254_v36  ;;  %v1266_v48 = vsub.f32 %v2471_v41, %v1265_v24 }
  0xaa   :  { %1085 = vmatpush.msra.mxu0 %v2724_v6  ;;  %1163 = vmatpush.msra.mxu2 %v2392_v33  ;;  %v2727_v21 = vand.u32 4294901760, %v2278_v50 }
  0xab   :  { %1122 = vmatpush.msra.mxu1 %v2158_v53  ;;  %1238 = vmatpush.msra.mxu3 %v1237_v49  ;;  %v2726_v53 = vand.u32 4294901760, %v2261_v10  ;;  %v1277_v49 = vand.u32 4294901760, %v2498_v20  ;;  %v1179_v10 = vsub.f32 %v2487_v27, %v1178_v46  ;;  %v1267_v50 = vand.u32 4294901760, %v1266_v48 }
  0xac   :  { %1089 = vmatpush.msra.mxu0 %v2725_v14  ;;  %1165 = vmatpush.msra.mxu2 %v2404_v42 }
  0xad   :  { %1124 = vmatpush.msra.mxu1 %v2169_v2  ;;  %1244 = vmatpush.msra.mxu3 %v1243_v43  ;;  %v1272_v2 = vsub.f32 %v2484_v45, %v1271_v57  ;;  %v1278_v1 = vsub.f32 %v2498_v20, %v1277_v49 }
  0xae   :  { %1093 = vmatpush.msra.mxu0 %v2726_v53  ;;  %1167 = vmatpush.msra.mxu2 %v2416_v29 }
  0xaf   :  { %1126 = vmatpush.msra.mxu1 %v2182_v28  ;;  %1250 = vmatpush.msra.mxu3 %v1249_v22  ;;  %v2728_v28 = vand.u32 4294901760, %v2300_v62  ;;  %v1273_v43 = vand.u32 4294901760, %v1272_v2  ;;  %v1279_v62 = vand.u32 4294901760, %v1278_v1 }
  0xb0   :  { %1097 = vmatpush.msra.mxu0 %v2727_v21  ;;  %1169 = vmatpush.msra.mxu2 %v2429_v16 }
  0xb1   :  { %1128 = vmatpush.msra.mxu1 %v2194_v5  ;;  %1256 = vmatpush.msra.mxu3 %v1255_v38  ;;  %v1180_v5 = vand.u32 4294901760, %v1179_v10 }
  0xb2   :  { %1101 = vmatpush.msra.mxu0 %v2728_v28  ;;  %1171 = vmatpush.msra.mxu2 %v2445_v7 }
  0xb3   :  { %1130 = vmatpush.msra.mxu1 %v2206_v0  ;;  %1262 = vmatpush.msra.mxu3 %v1261_v61  ;;  %v2729_v0 = vand.u32 4294901760, %v2293_v47 }
  0xb4   :  { %1103 = vmatmul.f32.vlgmr.msra.gmra.mxu0 %v2214_v12  ;;  %1173 = vmatpush.msra.mxu2 %v2458_v3 }
  0xb5   :  { %1288 = vmatpush.msrb.mxu0 %v2293_v47  ;;  %1132 = vmatpush.msra.mxu1 %v2220_v32  ;;  %v2730_v32 = vand.u32 4294901760, %v2314_v11 }
  0xb6   :  { %1268 = vmatpush.msra.mxu3 %v1267_v50  ;;  %1175 = vmatpush.msra.mxu2 %v2473_v52 }
  0xb7   :  { %1291 = vmatpush.msrb.mxu0 %v2314_v11  ;;  %1134 = vmatpush.msra.mxu1 %v2232_v23  ;;  %v2731_v23 = vand.u32 4294901760, %v2324_v59  ;;  %v2737_v11 = vand.u32 4294901760, %v2402_v39 }
  0xb8   :  { %1274 = vmatpush.msra.mxu3 %v1273_v43  ;;  %1181 = vmatmul.f32.vlgmr.msra.gmra.mxu2 %v1180_v5 }
  0xb9   :  { %1294 = vmatpush.msrb.mxu0 %v2324_v59  ;;  %1382 = vmatpush.msrb.mxu2 %v2729_v0 }
  0xba   :  { %1136 = vmatpush.msra.mxu1 %v2253_v40  ;;  %1280 = vmatpush.msra.mxu3 %v1279_v62  ;;  %v2732_v40 = vand.u32 4294901760, %v2332_v13 }
  0xbb   :  { %1282 = vmatmul.f32.vlgmr.msra.gmra.mxu3 %v2460_v31  ;;  %1297 = vmatpush.msrb.mxu0 %v2332_v13 }
  0xbc   :  { %1386 = vmatpush.msrb.mxu2 %v2730_v32  ;;  %1449 = vmatpush.msrb.mxu3 %v2266_v30 }
  0xbd   :  { %1138 = vmatpush.msra.mxu1 %v2272_v4  ;;  %1300 = vmatpush.msrb.mxu0 %v2343_v60  ;;  %v2735_v4 = vand.u32 4294901760, %v2376_v44 }
  0xbe   :  { %1140 = vmatmul.f32.vlgmr.msra.gmra.mxu1 %v2214_v12  ;;  %1390 = vmatpush.msrb.mxu2 %v2731_v23  ;;  %v2733_v12 = vand.u32 4294901760, %v2343_v60 }
  0xbf   :  { %1341 = vmatpush.msrb.mxu1 %v2266_v30  ;;  %1451 = vmatpush.msrb.mxu3 %v2285_v8  ;;  %v2734_v30 = vand.u32 4294901760, %v2362_v18 }
  0xc0   :  { %1303 = vmatpush.msrb.mxu0 %v2362_v18  ;;  %1394 = vmatpush.msrb.mxu2 %v2732_v40 }
  0xc1   :  { %1343 = vmatpush.msrb.mxu1 %v2285_v8  ;;  %1453 = vmatpush.msrb.mxu3 %v2302_v25 }
  0xc2   :  { %1306 = vmatpush.msrb.mxu0 %v2376_v44  ;;  %1398 = vmatpush.msrb.mxu2 %v2733_v12 }
  0xc3   :  { %1345 = vmatpush.msrb.mxu1 %v2302_v25  ;;  %1455 = vmatpush.msrb.mxu3 %v2307_v35  ;;  %v2736_v25 = vand.u32 4294901760, %v2390_v15 }
  0xc4   :  { %1309 = vmatpush.msrb.mxu0 %v2390_v15  ;;  %1402 = vmatpush.msrb.mxu2 %v2734_v30  ;;  %v2739_v15 = vand.u32 4294901760, %v2427_v37 }
  0xc5   :  { %1347 = vmatpush.msrb.mxu1 %v2307_v35  ;;  %1457 = vmatpush.msrb.mxu3 %v2319_v56 }
  0xc6   :  { %1312 = vmatpush.msrb.mxu0 %v2402_v39  ;;  %1406 = vmatpush.msrb.mxu2 %v2735_v4  ;;  %v159_v8 = vpop.f32.mrf.mxu0 }
  0xc7   :  { %1349 = vmatpush.msrb.mxu1 %v2319_v56  ;;  %1459 = vmatpush.msrb.mxu3 %v2336_v58  ;;  %v2738_v56 = vand.u32 4294901760, %v2414_v17 }
  0xc8   :  { %1315 = vmatpush.msrb.mxu0 %v2414_v17  ;;  %1410 = vmatpush.msrb.mxu2 %v2736_v25 }
  0xc9   :  { %1351 = vmatpush.msrb.mxu1 %v2336_v58  ;;  %1461 = vmatpush.msrb.mxu3 %v2351_v19 }
  0xca   :  { %1318 = vmatpush.msrb.mxu0 %v2427_v37  ;;  %1414 = vmatpush.msrb.mxu2 %v2737_v11 }
  0xcb   :  { %1353 = vmatpush.msrb.mxu1 %v2351_v19  ;;  %1463 = vmatpush.msrb.mxu3 %v2364_v26 }
  0xcc   :  { %1321 = vmatpush.msrb.mxu0 %v2440_v63  ;;  %1418 = vmatpush.msrb.mxu2 %v2738_v56 }
  0xcd   :  { %1355 = vmatpush.msrb.mxu1 %v2364_v26  ;;  %1465 = vmatpush.msrb.mxu3 %v2378_v9 }
  0xce   :  { %1324 = vmatpush.msrb.mxu0 %v2453_v54  ;;  %1422 = vmatpush.msrb.mxu2 %v2739_v15 }
  0xcf   :  { %1357 = vmatpush.msrb.mxu1 %v2378_v9  ;;  %1467 = vmatpush.msrb.mxu3 %v2392_v33 }
  0xd0   :  { %1327 = vmatpush.msrb.mxu0 %v2471_v41  ;;  %1426 = vmatpush.msrb.mxu2 %v1253_v34  ;;  %v260_v59 = vpop.f32.mrf.mxu1 }
  0xd1   :  { %1359 = vmatpush.msrb.mxu1 %v2392_v33  ;;  %1469 = vmatpush.msrb.mxu3 %v2404_v42  ;;  %v261_v47 = vadd.f32 %v260_v59, %v159_v8 }
  0xd2   :  { %1330 = vmatpush.msrb.mxu0 %v2484_v45  ;;  %1430 = vmatpush.msrb.mxu2 %v1259_v55  ;;  %v314_v60 = vpop.f32.mrf.mxu2  ;;  %v353_v13 = vpop.f32.mrf.mxu3 }
  0xd3   :  { %1361 = vmatpush.msrb.mxu1 %v2404_v42  ;;  %1471 = vmatpush.msrb.mxu3 %v2416_v29  ;;  %v315_v35 = vadd.f32 %v314_v60, %v261_v47 }
  0xd4   :  { %1333 = vmatpush.msrb.mxu0 %v2498_v20  ;;  %1434 = vmatpush.msrb.mxu2 %v1265_v24 }
  0xd5   :  { %1363 = vmatpush.msrb.mxu1 %v2416_v29  ;;  %1473 = vmatpush.msrb.mxu3 %v2429_v16  ;;  %v354_v58 = vadd.f32 %v353_v13, %v315_v35 }
  0xd6   :  { %1336 = vmatmul.f32.vlgmr.msrb.gmra.mxu0 %v2487_v27  ;;  %1438 = vmatpush.msrb.mxu2 %v1271_v57 }
  0xd7   :  { %1365 = vmatpush.msrb.mxu1 %v2429_v16  ;;  %1475 = vmatpush.msrb.mxu3 %v2445_v7  ;;  %v422_v19 = vpop.f32.mrf.mxu0 }
  0xd8   :  { %1442 = vmatpush.msrb.mxu2 %v1277_v49  ;;  %v423_v18 = vadd.f32 %v422_v19, %v354_v58 }
  0xd9   :  { %1367 = vmatpush.msrb.mxu1 %v2445_v7  ;;  %1477 = vmatpush.msrb.mxu3 %v2458_v3 }
  0xda   :  { %1444 = vmatmul.f32.vlgmr.msrb.gmra.mxu2 %v2460_v31  ;;  %v459_v26 = vpop.f32.mrf.mxu1 }
  0xdb   :  { %1369 = vmatpush.msrb.mxu1 %v2458_v3  ;;  %1479 = vmatpush.msrb.mxu3 %v2473_v52  ;;  %v460_v44 = vadd.f32 %v459_v26, %v423_v18  ;;  %v500_v9 = vpop.f32.mrf.mxu2 }
  0xdc   :  { %1481 = vmatmul.f32.vlgmr.msrb.gmra.mxu3 %v2460_v31 }
  0xdd   :  { %1371 = vmatpush.msrb.mxu1 %v2473_v52  ;;  %v501_v33 = vadd.f32 %v500_v9, %v460_v44 }
  0xde   :  { %1375 = vmatmul.f32.vlgmr.msrb.gmra.mxu1 %v1178_v46  ;;  %v601_v39 = vpop.f32.mrf.mxu3 }
  0xdf   :  { %v602_v17 = vadd.f32 %v601_v39, %v501_v33 }
  0xed   :  { %v655_v42 = vpop.f32.mrf.mxu0 }
  0xee   :  { %v656_v37 = vadd.f32 %v655_v42, %v602_v17 }
  0xf7   :  { %v694_v29 = vpop.f32.mrf.mxu1  ;;  %v763_v63 = vpop.f32.mrf.mxu2 }
  0xf8   :  { %v695_v16 = vadd.f32 %v694_v29, %v656_v37 }
  0xfa   :  { %v764_v7 = vadd.f32 %v763_v63, %v695_v16  ;;  %v800_v54 = vpop.f32.mrf.mxu3 }
  0xfc   :  { %v801_v31 = vadd.f32 %v800_v54, %v764_v7 }
 0x10f   :  { %v841_v3 = vpop.f32.mrf.mxu0 }
 0x110   :  { %v842_v41 = vadd.f32 %v841_v3, %v801_v31 }
 0x119   :  { %v942_v34 = vpop.f32.mrf.mxu1  ;;  %v996_v55 = vpop.f32.mrf.mxu2 }
 0x11a   :  { %v943_v52 = vadd.f32 %v942_v34, %v842_v41 }
 0x11c   :  { %v997_v45 = vadd.f32 %v996_v55, %v943_v52  ;;  %v1035_v27 = vpop.f32.mrf.mxu3 }
 0x11e   :  { %v1036_v6 = vadd.f32 %v1035_v27, %v997_v45 }
 0x131   :  { %v1104_v36 = vpop.f32.mrf.mxu0 }
 0x132   :  { %v1105_v20 = vadd.f32 %v1104_v36, %v1036_v6 }
 0x13b   :  { %v1141_v24 = vpop.f32.mrf.mxu1  ;;  %v1182_v51 = vpop.f32.mrf.mxu2 }
 0x13c   :  { %v1142_v22 = vadd.f32 %v1141_v24, %v1105_v20 }
 0x13e   :  { %v1183_v14 = vadd.f32 %v1182_v51, %v1142_v22  ;;  %v1283_v57 = vpop.f32.mrf.mxu3 }
 0x140   :  { %v1284_v38 = vadd.f32 %v1283_v57, %v1183_v14 }
 0x153   :  { %v1337_v46 = vpop.f32.mrf.mxu0 }
 0x154   :  { %v1338_v53 = vadd.f32 %v1337_v46, %v1284_v38 }
 0x15b   :  { %v1376_v48 = vpop.f32.mrf.mxu1 }
 0x15c   :  { %v1377_v49 = vadd.f32 %v1376_v48, %v1338_v53 }
 0x15d   :  { %v1445_v61 = vpop.f32.mrf.mxu2 }
 0x15e   :  { %v1446_v21 = vadd.f32 %v1445_v61, %v1377_v49 }
 0x15f   :  { %v1482_v2 = vpop.f32.mrf.mxu3 }
 0x160   :  { %v1483_v10 = vadd.f32 %v1482_v2, %v1446_v21 }
 0x162   :  { %1485 = vst [vmem:[#allocation7] sm:$0xf] %v1483_v10 }
 0x163   :  { %1496 = dma.vmem_to_hbm [thread:$0]  %s1492_s1, 64, %s1494_s23, [#allocation4]  }
 0x164   :  { %1585 = dma.done.wait [#allocation4], 64  }
 0x165   :  { %1586 = vsyncadd [#allocation4], 4294967232 }
 0x166   :  { %1501 = vsyncpa [#allocation3], 1 }
 0x167   :  { %1502 = vsyncpa [#allocation6], 1 }
 0x168   :  { %1503 = vsyncpa [#allocation4], 1 }

</bundles_post_ra>
